<compile_context>
chip_gen: v7x
topology: tpu7x:2x2x1
jax: 0.10.0
libtpu: 0.0.40
codegen_flags: <defaults>
</compile_context>

<pallas_src>
import jax
import jax.numpy as jnp
from jax import lax
from jax.experimental import pallas as pl
from jax.experimental.pallas import tpu as pltpu


# ----------------------------------------------------------------------------
# Pallas kernel: sequential tanh-RNN recurrence over one tile of timesteps.
# ----------------------------------------------------------------------------
def rnn_recurrent_kernel(xproj_ref, whh_ref, out_ref, h_scratch):
    """One grid step == `Tt` timesteps of h_t = tanh(xproj_t + h_{t-1} @ Whh^T).

    xproj_ref : (Tt, B, H)  precomputed x_t @ W_ih^T + b_ih + b_hh for the tile
    whh_ref   : (H, H)      W_hh^T (resident across all grid steps)
    out_ref   : (Tt, B, H)  per-timestep hidden states h_t for the tile
    h_scratch : VMEM (B, H) f32 hidden state carried across grid steps
    """
    @pl.when(pl.program_id(0) == 0)
    def _():
        h_scratch[...] = jnp.zeros_like(h_scratch)

    tt = xproj_ref.shape[0]                 # static tile length
    whh = whh_ref[...]                      # resident weight, loaded once/tile

    def step(i, h):
        h_new = jnp.tanh(
            xproj_ref[i]                    # (B, H) slab
            + jnp.dot(h, whh, preferred_element_type=jnp.float32)
        )
        out_ref[i] = h_new.astype(out_ref.dtype)
        return h_new

    # Fully-unrolled in-kernel time loop (static trip count -> static indices,
    # full LLO scheduling visibility for the tiny per-step matmul + tanh).
    h_scratch[...] = lax.fori_loop(0, tt, step, h_scratch[...], unroll=True)


# ----------------------------------------------------------------------------
# Wrapper around pallas_call for the recurrence.
# ----------------------------------------------------------------------------
def rnn_forward_pallas(xproj_sbH, w_hh, time_tile=None):
    """xproj_sbH: (S, B, H) f32 precomputed input projection (time-major).

    Returns outputs_sbH: (S, B, H) f32 hidden states for every timestep.
    """
    S, B, H = xproj_sbH.shape

    if time_tile is None:
        time_tile = min(S, 64)
    time_tile = max(1, min(time_tile, S))

    # Pad the time axis so the grid is always over full tiles.  Padded steps
    # run after the last real timestep, so they cannot affect real outputs.
    S_pad = pl.cdiv(S, time_tile) * time_tile
    if S_pad != S:
        xproj_sbH = jnp.concatenate(
            [xproj_sbH, jnp.zeros((S_pad - S, B, H), xproj_sbH.dtype)], axis=0
        )

    whh_t = w_hh.T.astype(jnp.float32)      # (H, H), right-multiply form

    grid_spec = pltpu.PrefetchScalarGridSpec(
        num_scalar_prefetch=0,
        grid=(S_pad // time_tile,),
        in_specs=[
            # Streamed tile of precomputed projections for `time_tile` steps.
            pl.BlockSpec((time_tile, B, H), lambda t: (t, 0, 0)),
            # Resident recurrent weight (same block every step -> no re-DMA).
            pl.BlockSpec((H, H), lambda t: (0, 0)),
        ],
        out_specs=pl.BlockSpec((time_tile, B, H), lambda t: (t, 0, 0)),
        scratch_shapes=[pltpu.VMEM((B, H), jnp.float32)],
    )

    outputs = pl.pallas_call(
        rnn_recurrent_kernel,
        out_shape=jax.ShapeDtypeStruct((S_pad, B, H), jnp.float32),
        grid_spec=grid_spec,
        compiler_params=pltpu.CompilerParams(
            # The time axis carries the recurrence -> must stay sequential.
            dimension_semantics=("arbitrary",),
        ),
    )(xproj_sbH, whh_t)
    return outputs[:S]


# ----------------------------------------------------------------------------
# Full Encoder forward (embedding + hoisted input projection + recurrence).
# ----------------------------------------------------------------------------
def encoder_forward(token_ids, params, time_tile=None):
    """token_ids: (B, S) int32. Returns (outputs (B,S,H), hidden (1,B,H))."""
    # Embedding lookup directly in time-major (S, B, E): only the tiny int-id
    # matrix is transposed, never the large activation tensor.
    emb_sbE = jnp.take(params["embedding"], token_ids.T, axis=0)     # (S, B, E)
    S, B, E = emb_sbE.shape
    H = params["w_ih"].shape[0]

    # Hoisted input projection for all timesteps: one big MXU-friendly matmul
    # (plain XLA), producing xproj already in the kernel's (S, B, H) layout.
    bias = (params["b_ih"] + params["b_hh"]).astype(jnp.float32)     # (H,)
    xproj = (
        emb_sbE.reshape(S * B, E).astype(jnp.float32)
        @ params["w_ih"].T.astype(jnp.float32)
        + bias
    ).reshape(S, B, H)

    outputs_sbH = rnn_forward_pallas(xproj, params["w_hh"], time_tile=time_tile)

    hidden = outputs_sbH[-1:]                                        # (1, B, H)
    # PyTorch batch_first convention for the outputs tensor.
    outputs = jnp.transpose(outputs_sbH, (1, 0, 2))                  # (B, S, H)
    return outputs, hidden


# ----------------------------------------------------------------------------
# Parameter init matching PyTorch defaults (Embedding ~ N(0,1); RNN ~ U(+-1/sqrt(H))).
# ----------------------------------------------------------------------------
def init_params(key, input_size, embedding_size, hidden_size):
    k0, k1, k2, k3, k4 = jax.random.split(key, 5)
    bound = 1.0 / jnp.sqrt(hidden_size)
    return {
        "embedding": jax.random.normal(k0, (input_size, embedding_size), jnp.float32),
        "w_ih": jax.random.uniform(k1, (hidden_size, embedding_size), jnp.float32, -bound, bound),
        "w_hh": jax.random.uniform(k2, (hidden_size, hidden_size), jnp.float32, -bound, bound),
        "b_ih": jax.random.uniform(k3, (hidden_size,), jnp.float32, -bound, bound),
        "b_hh": jax.random.uniform(k4, (hidden_size,), jnp.float32, -bound, bound),
    }


def encoder_forward_ref(token_ids, params):
    """Pure-JAX reference (mirrors the PyTorch math) for correctness checking."""
    emb = jnp.take(params["embedding"], token_ids, axis=0)           # (B, S, E)
    B, S, _ = emb.shape
    H = params["w_ih"].shape[0]

    def step(h, x_t):
        h_new = jnp.tanh(x_t @ params["w_ih"].T + params["b_ih"]
                         + h @ params["w_hh"].T + params["b_hh"])
        return h_new, h_new

    h0 = jnp.zeros((B, H), jnp.float32)
    hT, outs = lax.scan(step, h0, jnp.transpose(emb, (1, 0, 2)))
    return jnp.transpose(outs, (1, 0, 2)), hT[None]


if __name__ == "__main__":
    input_size = 50       # vocab size
    embedding_size = 32
    hidden_size = 32

    key = jax.random.PRNGKey(0)
    pkey, ikey = jax.random.split(key)
    params = init_params(pkey, input_size, embedding_size, hidden_size)

    # Three configs:
    #   (2, 8,  8) -> single grid step, tile == full sequence
    #   (4, 24, 8) -> hidden-state carry across 3 grid steps
    #   (3, 13, 8) -> non-divisible sequence length -> exercises time padding
    for (batch, seq, time_tile) in [(2, 8, 8), (4, 24, 8), (3, 13, 8)]:
        ikey, sub = jax.random.split(ikey)
        token_ids = jax.random.randint(sub, (batch, seq), 0, input_size, jnp.int32)

        outputs, hidden = jax.block_until_ready(
            encoder_forward(token_ids, params, time_tile=time_tile)
        )

        ref_out, ref_hid = encoder_forward_ref(token_ids, params)
        assert outputs.shape == (batch, seq, hidden_size)
        assert hidden.shape == (1, batch, hidden_size)
        assert jnp.allclose(outputs, ref_out, atol=1e-4, rtol=1e-4)
        assert jnp.allclose(hidden, ref_hid, atol=1e-4, rtol=1e-4)

    print("KERNEL_OK")
</pallas_src>

<mosaic_0001>
module attributes {stable_mosaic.version = 11 : i64} {
  func.func @rnn_recurrent_kernel(%arg0: i32, %arg1: memref<8x2x32xf32, #tpu.memory_space<vmem>>, %arg2: memref<32x32xf32, #tpu.memory_space<vmem>>, %arg3: memref<8x2x32xf32, #tpu.memory_space<vmem>>, %arg4: memref<2x32xf32, #tpu.memory_space<vmem>>) attributes {dimension_semantics = [#tpu.dimension_semantics<arbitrary>], iteration_bounds = array<i64: 1>, scalar_prefetch = 0 : i64, scratch_operands = 1 : i64, tpu.core_type = #tpu.core_type<tc>, window_params = [{transform_indices = @transform_0, window_bounds = array<i64: 8, 2, 32>}, {pipeline_mode = #tpu.pipeline_mode<synchronous>, transform_indices = @transform_1, window_bounds = array<i64: 32, 32>}, {transform_indices = @transform_2, window_bounds = array<i64: 8, 2, 32>}]} {
    %c0_i32 = arith.constant 0 : i32
    %0 = arith.cmpi eq, %arg0, %c0_i32 : i32
    %1 = arith.extui %0 : i1 to i32
    %c0_i32_0 = arith.constant 0 : i32
    %2 = arith.cmpi ne, %1, %c0_i32_0 : i32
    scf.if %2 {
      %cst_46 = arith.constant 0.000000e+00 : f32
      %86 = vector.broadcast %cst_46 : f32 to vector<2x32xf32>
      %c0_47 = arith.constant 0 : index
      %c0_48 = arith.constant 0 : index
      %87 = vector.load %arg4[%c0_47, %c0_48] : memref<2x32xf32, #tpu.memory_space<vmem>>, vector<2x32xf32>
      tpu.vector_store %arg4[%c0_47, %c0_48], %86 {strides = array<i32>} : memref<2x32xf32, #tpu.memory_space<vmem>>, vector<2x32xf32>,
    } else {
    }
    %c0 = arith.constant 0 : index
    %c0_1 = arith.constant 0 : index
    %3 = vector.load %arg2[%c0, %c0_1] : memref<32x32xf32, #tpu.memory_space<vmem>>, vector<32x32xf32>
    %c0_2 = arith.constant 0 : index
    %c0_3 = arith.constant 0 : index
    %4 = vector.load %arg4[%c0_2, %c0_3] : memref<2x32xf32, #tpu.memory_space<vmem>>, vector<2x32xf32>
    %c0_i32_4 = arith.constant 0 : i32
    %5 = arith.index_cast %c0_i32_4 : i32 to index
    %c0_5 = arith.constant 0 : index
    %c0_6 = arith.constant 0 : index
    %6 = vector.load %arg1[%5, %c0_5, %c0_6] : memref<8x2x32xf32, #tpu.memory_space<vmem>>, vector<1x2x32xf32>
    %7 = vector.shape_cast %6 : vector<1x2x32xf32> to vector<2x32xf32>
    %cst = arith.constant dense<0.000000e+00> : vector<2x32xf32>
    %8 = tpu.matmul %4, %3, %cst {dimension_numbers = #tpu.dot_dimension_numbers<[1], [0], [0], [1], [0, 0, 1, 1], [], []>} : vector<2x32xf32>, vector<32x32xf32>, vector<2x32xf32> -> vector<2x32xf32>
    %9 = arith.addf %7, %8 : vector<2x32xf32>
    %10 = math.tanh %9 : vector<2x32xf32>
    %11 = arith.index_cast %c0_i32_4 : i32 to index
    %c0_7 = arith.constant 0 : index
    %c0_8 = arith.constant 0 : index
    %12 = vector.load %arg3[%11, %c0_7, %c0_8] : memref<8x2x32xf32, #tpu.memory_space<vmem>>, vector<1x2x32xf32>
    %13 = vector.shape_cast %12 : vector<1x2x32xf32> to vector<2x32xf32>
    %14 = vector.shape_cast %10 : vector<2x32xf32> to vector<1x2x32xf32>
    tpu.vector_store %arg3[%11, %c0_7, %c0_8], %14 {strides = array<i32>} : memref<8x2x32xf32, #tpu.memory_space<vmem>>, vector<1x2x32xf32>,
    %c1_i32 = arith.constant 1 : i32
    %15 = arith.index_cast %c1_i32 : i32 to index
    %c0_9 = arith.constant 0 : index
    %c0_10 = arith.constant 0 : index
    %16 = vector.load %arg1[%15, %c0_9, %c0_10] : memref<8x2x32xf32, #tpu.memory_space<vmem>>, vector<1x2x32xf32>
    %17 = vector.shape_cast %16 : vector<1x2x32xf32> to vector<2x32xf32>
    %cst_11 = arith.constant dense<0.000000e+00> : vector<2x32xf32>
    %18 = tpu.matmul %10, %3, %cst_11 {dimension_numbers = #tpu.dot_dimension_numbers<[1], [0], [0], [1], [0, 0, 1, 1], [], []>} : vector<2x32xf32>, vector<32x32xf32>, vector<2x32xf32> -> vector<2x32xf32>
    %19 = arith.addf %17, %18 : vector<2x32xf32>
    %20 = math.tanh %19 : vector<2x32xf32>
    %21 = arith.index_cast %c1_i32 : i32 to index
    %c0_12 = arith.constant 0 : index
    %c0_13 = arith.constant 0 : index
    %22 = vector.load %arg3[%21, %c0_12, %c0_13] : memref<8x2x32xf32, #tpu.memory_space<vmem>>, vector<1x2x32xf32>
    %23 = vector.shape_cast %22 : vector<1x2x32xf32> to vector<2x32xf32>
    %24 = vector.shape_cast %20 : vector<2x32xf32> to vector<1x2x32xf32>
    tpu.vector_store %arg3[%21, %c0_12, %c0_13], %24 {strides = array<i32>} : memref<8x2x32xf32, #tpu.memory_space<vmem>>, vector<1x2x32xf32>,
    %c2_i32 = arith.constant 2 : i32
    %25 = arith.index_cast %c2_i32 : i32 to index
    %c0_14 = arith.constant 0 : index
    %c0_15 = arith.constant 0 : index
    %26 = vector.load %arg1[%25, %c0_14, %c0_15] : memref<8x2x32xf32, #tpu.memory_space<vmem>>, vector<1x2x32xf32>
    %27 = vector.shape_cast %26 : vector<1x2x32xf32> to vector<2x32xf32>
    %cst_16 = arith.constant dense<0.000000e+00> : vector<2x32xf32>
    %28 = tpu.matmul %20, %3, %cst_16 {dimension_numbers = #tpu.dot_dimension_numbers<[1], [0], [0], [1], [0, 0, 1, 1], [], []>} : vector<2x32xf32>, vector<32x32xf32>, vector<2x32xf32> -> vector<2x32xf32>
    %29 = arith.addf %27, %28 : vector<2x32xf32>
    %30 = math.tanh %29 : vector<2x32xf32>
    %31 = arith.index_cast %c2_i32 : i32 to index
    %c0_17 = arith.constant 0 : index
    %c0_18 = arith.constant 0 : index
    %32 = vector.load %arg3[%31, %c0_17, %c0_18] : memref<8x2x32xf32, #tpu.memory_space<vmem>>, vector<1x2x32xf32>
    %33 = vector.shape_cast %32 : vector<1x2x32xf32> to vector<2x32xf32>
    %34 = vector.shape_cast %30 : vector<2x32xf32> to vector<1x2x32xf32>
    tpu.vector_store %arg3[%31, %c0_17, %c0_18], %34 {strides = array<i32>} : memref<8x2x32xf32, #tpu.memory_space<vmem>>, vector<1x2x32xf32>,
    %c3_i32 = arith.constant 3 : i32
    %35 = arith.index_cast %c3_i32 : i32 to index
    %c0_19 = arith.constant 0 : index
    %c0_20 = arith.constant 0 : index
    %36 = vector.load %arg1[%35, %c0_19, %c0_20] : memref<8x2x32xf32, #tpu.memory_space<vmem>>, vector<1x2x32xf32>
    %37 = vector.shape_cast %36 : vector<1x2x32xf32> to vector<2x32xf32>
    %cst_21 = arith.constant dense<0.000000e+00> : vector<2x32xf32>
    %38 = tpu.matmul %30, %3, %cst_21 {dimension_numbers = #tpu.dot_dimension_numbers<[1], [0], [0], [1], [0, 0, 1, 1], [], []>} : vector<2x32xf32>, vector<32x32xf32>, vector<2x32xf32> -> vector<2x32xf32>
    %39 = arith.addf %37, %38 : vector<2x32xf32>
    %40 = math.tanh %39 : vector<2x32xf32>
    %41 = arith.index_cast %c3_i32 : i32 to index
    %c0_22 = arith.constant 0 : index
    %c0_23 = arith.constant 0 : index
    %42 = vector.load %arg3[%41, %c0_22, %c0_23] : memref<8x2x32xf32, #tpu.memory_space<vmem>>, vector<1x2x32xf32>
    %43 = vector.shape_cast %42 : vector<1x2x32xf32> to vector<2x32xf32>
    %44 = vector.shape_cast %40 : vector<2x32xf32> to vector<1x2x32xf32>
    tpu.vector_store %arg3[%41, %c0_22, %c0_23], %44 {strides = array<i32>} : memref<8x2x32xf32, #tpu.memory_space<vmem>>, vector<1x2x32xf32>,
    %c4_i32 = arith.constant 4 : i32
    %45 = arith.index_cast %c4_i32 : i32 to index
    %c0_24 = arith.constant 0 : index
    %c0_25 = arith.constant 0 : index
    %46 = vector.load %arg1[%45, %c0_24, %c0_25] : memref<8x2x32xf32, #tpu.memory_space<vmem>>, vector<1x2x32xf32>
    %47 = vector.shape_cast %46 : vector<1x2x32xf32> to vector<2x32xf32>
    %cst_26 = arith.constant dense<0.000000e+00> : vector<2x32xf32>
    %48 = tpu.matmul %40, %3, %cst_26 {dimension_numbers = #tpu.dot_dimension_numbers<[1], [0], [0], [1], [0, 0, 1, 1], [], []>} : vector<2x32xf32>, vector<32x32xf32>, vector<2x32xf32> -> vector<2x32xf32>
    %49 = arith.addf %47, %48 : vector<2x32xf32>
    %50 = math.tanh %49 : vector<2x32xf32>
    %51 = arith.index_cast %c4_i32 : i32 to index
    %c0_27 = arith.constant 0 : index
    %c0_28 = arith.constant 0 : index
    %52 = vector.load %arg3[%51, %c0_27, %c0_28] : memref<8x2x32xf32, #tpu.memory_space<vmem>>, vector<1x2x32xf32>
    %53 = vector.shape_cast %52 : vector<1x2x32xf32> to vector<2x32xf32>
    %54 = vector.shape_cast %50 : vector<2x32xf32> to vector<1x2x32xf32>
    tpu.vector_store %arg3[%51, %c0_27, %c0_28], %54 {strides = array<i32>} : memref<8x2x32xf32, #tpu.memory_space<vmem>>, vector<1x2x32xf32>,
    %c5_i32 = arith.constant 5 : i32
    %55 = arith.index_cast %c5_i32 : i32 to index
    %c0_29 = arith.constant 0 : index
    %c0_30 = arith.constant 0 : index
    %56 = vector.load %arg1[%55, %c0_29, %c0_30] : memref<8x2x32xf32, #tpu.memory_space<vmem>>, vector<1x2x32xf32>
    %57 = vector.shape_cast %56 : vector<1x2x32xf32> to vector<2x32xf32>
    %cst_31 = arith.constant dense<0.000000e+00> : vector<2x32xf32>
    %58 = tpu.matmul %50, %3, %cst_31 {dimension_numbers = #tpu.dot_dimension_numbers<[1], [0], [0], [1], [0, 0, 1, 1], [], []>} : vector<2x32xf32>, vector<32x32xf32>, vector<2x32xf32> -> vector<2x32xf32>
    %59 = arith.addf %57, %58 : vector<2x32xf32>
    %60 = math.tanh %59 : vector<2x32xf32>
    %61 = arith.index_cast %c5_i32 : i32 to index
    %c0_32 = arith.constant 0 : index
    %c0_33 = arith.constant 0 : index
    %62 = vector.load %arg3[%61, %c0_32, %c0_33] : memref<8x2x32xf32, #tpu.memory_space<vmem>>, vector<1x2x32xf32>
    %63 = vector.shape_cast %62 : vector<1x2x32xf32> to vector<2x32xf32>
    %64 = vector.shape_cast %60 : vector<2x32xf32> to vector<1x2x32xf32>
    tpu.vector_store %arg3[%61, %c0_32, %c0_33], %64 {strides = array<i32>} : memref<8x2x32xf32, #tpu.memory_space<vmem>>, vector<1x2x32xf32>,
    %c6_i32 = arith.constant 6 : i32
    %65 = arith.index_cast %c6_i32 : i32 to index
    %c0_34 = arith.constant 0 : index
    %c0_35 = arith.constant 0 : index
    %66 = vector.load %arg1[%65, %c0_34, %c0_35] : memref<8x2x32xf32, #tpu.memory_space<vmem>>, vector<1x2x32xf32>
    %67 = vector.shape_cast %66 : vector<1x2x32xf32> to vector<2x32xf32>
    %cst_36 = arith.constant dense<0.000000e+00> : vector<2x32xf32>
    %68 = tpu.matmul %60, %3, %cst_36 {dimension_numbers = #tpu.dot_dimension_numbers<[1], [0], [0], [1], [0, 0, 1, 1], [], []>} : vector<2x32xf32>, vector<32x32xf32>, vector<2x32xf32> -> vector<2x32xf32>
    %69 = arith.addf %67, %68 : vector<2x32xf32>
    %70 = math.tanh %69 : vector<2x32xf32>
    %71 = arith.index_cast %c6_i32 : i32 to index
    %c0_37 = arith.constant 0 : index
    %c0_38 = arith.constant 0 : index
    %72 = vector.load %arg3[%71, %c0_37, %c0_38] : memref<8x2x32xf32, #tpu.memory_space<vmem>>, vector<1x2x32xf32>
    %73 = vector.shape_cast %72 : vector<1x2x32xf32> to vector<2x32xf32>
    %74 = vector.shape_cast %70 : vector<2x32xf32> to vector<1x2x32xf32>
    tpu.vector_store %arg3[%71, %c0_37, %c0_38], %74 {strides = array<i32>} : memref<8x2x32xf32, #tpu.memory_space<vmem>>, vector<1x2x32xf32>,
    %c7_i32 = arith.constant 7 : i32
    %75 = arith.index_cast %c7_i32 : i32 to index
    %c0_39 = arith.constant 0 : index
    %c0_40 = arith.constant 0 : index
    %76 = vector.load %arg1[%75, %c0_39, %c0_40] : memref<8x2x32xf32, #tpu.memory_space<vmem>>, vector<1x2x32xf32>
    %77 = vector.shape_cast %76 : vector<1x2x32xf32> to vector<2x32xf32>
    %cst_41 = arith.constant dense<0.000000e+00> : vector<2x32xf32>
    %78 = tpu.matmul %70, %3, %cst_41 {dimension_numbers = #tpu.dot_dimension_numbers<[1], [0], [0], [1], [0, 0, 1, 1], [], []>} : vector<2x32xf32>, vector<32x32xf32>, vector<2x32xf32> -> vector<2x32xf32>
    %79 = arith.addf %77, %78 : vector<2x32xf32>
    %80 = math.tanh %79 : vector<2x32xf32>
    %81 = arith.index_cast %c7_i32 : i32 to index
    %c0_42 = arith.constant 0 : index
    %c0_43 = arith.constant 0 : index
    %82 = vector.load %arg3[%81, %c0_42, %c0_43] : memref<8x2x32xf32, #tpu.memory_space<vmem>>, vector<1x2x32xf32>
    %83 = vector.shape_cast %82 : vector<1x2x32xf32> to vector<2x32xf32>
    %84 = vector.shape_cast %80 : vector<2x32xf32> to vector<1x2x32xf32>
    tpu.vector_store %arg3[%81, %c0_42, %c0_43], %84 {strides = array<i32>} : memref<8x2x32xf32, #tpu.memory_space<vmem>>, vector<1x2x32xf32>,
    %c8_i32 = arith.constant 8 : i32
    %c0_44 = arith.constant 0 : index
    %c0_45 = arith.constant 0 : index
    %85 = vector.load %arg4[%c0_44, %c0_45] : memref<2x32xf32, #tpu.memory_space<vmem>>, vector<2x32xf32>
    tpu.vector_store %arg4[%c0_44, %c0_45], %80 {strides = array<i32>} : memref<2x32xf32, #tpu.memory_space<vmem>>, vector<2x32xf32>,
    return
  }
  func.func @transform_0(%arg0: i32) -> (i32, i32, i32) {
    %c0_i32 = arith.constant 0 : i32
    %c0_i32_0 = arith.constant 0 : i32
    %c0_i32_1 = arith.constant 0 : i32
    return %arg0, %c0_i32, %c0_i32_0 : i32, i32, i32
  }
  func.func @transform_1(%arg0: i32) -> (i32, i32) {
    %c0_i32 = arith.constant 0 : i32
    %c0_i32_0 = arith.constant 0 : i32
    %c0_i32_1 = arith.constant 0 : i32
    return %c0_i32, %c0_i32_0 : i32, i32
  }
  func.func @transform_2(%arg0: i32) -> (i32, i32, i32) {
    %c0_i32 = arith.constant 0 : i32
    %c0_i32_0 = arith.constant 0 : i32
    %c0_i32_1 = arith.constant 0 : i32
    return %arg0, %c0_i32, %c0_i32_0 : i32, i32, i32
  }
}

</mosaic_0001>

<bundles_post_ra>
// kernel: tpu_custom_call.1
= control target key start
LH: loop header
LB: loop body
LE: loop exit
PB: predicated region body
PF: predicated region fallthrough
CT: control target
= control target key end

     0   :  { %7 = vsyncpa [#allocation4], 0  ;;  %s1122_s0 = inlined_call_operand.hbm [shape: f32[8,2,32], index: 0, kind: input, shape index: {}]   ;;  %s1123_s1 = inlined_call_operand.hbm [shape: f32[32,32], index: 1, kind: input, shape index: {}]   ;;  %s1124_s2 = inlined_call_operand.hbm [shape: f32[8,2,32], index: 2, kind: output, shape index: {}]  }
   0x1   :  { %8 = vsyncpa [#allocation7], 0 }
   0x2   :  { %9 = vsyncpa [#allocation5], 0  ;;  %s984_s9 = smov [#allocation3]   ;;  %s912_s13 = scalar_lea.hbm %s1122_s0, 256 }
   0x3   :  { %s15_s10 = sshll.u32 %s984_s9, 4  ;;  %p913_p0 = scmp.ne.s32.totalorder %s1122_s0, %s912_s13  ;;  %s16_s10 = int_to_ptr.vmem [resolvable:$true] %s15_s10 }
   0x4   :  { %p916_p1 = scmp.lt.u32.totalorder %s912_s13, %s1122_s0 }
   0x6   :  { %p918_p2 = pnand %p916_p1, %p913_p0 }
   0x8   :  { %921 = shalt.err (!%p918_p2)
}
   0x9   :  { %s922_s18 = scalar_lea.vmem %s16_s10, 256  ;;  %p927_p4 = scmp.lt.s32.totalorder %s16_s10, %s16_s10 }
   0xa   :  { %p923_p3 = scmp.ne.s32.totalorder %s16_s10, %s922_s18  ;;  %p928_p5 = scmp.lt.s32.totalorder %s922_s18, %s922_s18 }
   0xc   :  { %p929_p6 = por %p928_p5, %p927_p4 }
   0xe   :  { %p930_p7 = pnand %p929_p6, %p923_p3 }
  0x10   :  { %933 = shalt.err (!%p930_p7)
}
  0x11   :  { %s985_s19 = smov 32   ;;  %s986_s20 = smov 2  }
  0x12   :  { %21 = dma.hbm_to_vmem [thread:$0]  %s1122_s0, 256, %s16_s10, [#allocation4], %s985_s19, %s985_s19, %s986_s20  }
  0x13   :  { %s987_s23 = smov [#allocation6]   ;;  %s934_s27 = scalar_lea.hbm %s1123_s1, 512 }
  0x14   :  { %s27_s24 = sshll.u32 %s987_s23, 4  ;;  %p935_p8 = scmp.ne.s32.totalorder %s1123_s1, %s934_s27  ;;  %s28_s24 = int_to_ptr.vmem [resolvable:$true] %s27_s24 }
  0x15   :  { %p938_p9 = scmp.lt.u32.totalorder %s934_s27, %s1123_s1 }
  0x17   :  { %p940_p10 = pnand %p938_p9, %p935_p8 }
  0x19   :  { %943 = shalt.err (!%p940_p10)
}
  0x1a   :  { %s944_s4 = scalar_lea.vmem %s28_s24, 512  ;;  %p949_p12 = scmp.lt.s32.totalorder %s28_s24, %s28_s24 }
  0x1b   :  { %p945_p11 = scmp.ne.s32.totalorder %s28_s24, %s944_s4  ;;  %p950_p13 = scmp.lt.s32.totalorder %s944_s4, %s944_s4 }
  0x1d   :  { %p951_p0 = por %p950_p13, %p949_p12 }
  0x1f   :  { %p952_p1 = pnand %p951_p0, %p945_p11 }
  0x21   :  { %955 = shalt.err (!%p952_p1)
}
  0x22   :  { %s988_s0 = smov 128   ;;  %s989_s5 = smov 8  }
  0x23   :  { %33 = dma.hbm_to_vmem [thread:$0]  %s1123_s1, 512, %s28_s24, [#allocation7], %s988_s0, %s988_s0, %s989_s5  }
  0x24   :  { %978 = dma.done.wait [#allocation4], 256  }
  0x25   :  { %979 = vsyncadd [#allocation4], 4294967040 }
  0x26   :  { %980 = dma.done.wait [#allocation7], 512  }
  0x27   :  { %981 = vsyncadd [#allocation7], 4294966784  ;;  %vm44_vm0 = vcmask 254976   ;;  %v990_v0 = vmov 0.0|0.0   ;;  %vm991_vm1 = vmmov 0   ;;  %v992_v1 = vmov 0.0  }
  0x28   :  { %838 = vmatprep.subr.bf16.mxu0 %v990_v0  ;;  %758 = vmatprep.mubr.msk.f32.mxu0 %vm991_vm1, %v992_v1  ;;  %45 = vst.msk [vmem:[#allocation2] sm:$0x3] %vm44_vm0, %v992_v1  ;;  %v46_v2 = vld [vmem:[#allocation6] sm:$0xff]  ;;  %v47_v3 = vld [vmem:[#allocation6 + $0x8] sm:$0xff]  ;;  %v48_v4 = vld [vmem:[#allocation6 + $0x10] sm:$0xff]  ;;  %vm52_vm2 = vcmask 261120  }
  0x29   :  { %844 = vmatprep.subr.bf16.mxu1 %v990_v0  ;;  %769 = vmatprep.mubr.msk.f32.mxu1 %vm991_vm1, %v992_v1  ;;  %v1044_v5 = vpack.c.bf16 %v47_v3, %v46_v2  ;;  %v49_v6 = vld [vmem:[#allocation6 + $0x18] sm:$0xff]  ;;  %v51_v9 = vld [vmem:[#allocation3] sm:$0x3]  ;;  %v131_v14 = vld [vmem:[#allocation3 + $0x2] sm:$0x3]  ;;  %s993_s1 = smov [#allocation8]  }
  0x2a   :  { %v1047_v7 = vpack.c.bf16 %v49_v6, %v48_v4  ;;  %v210_v19 = vld [vmem:[#allocation3 + $0x4] sm:$0x3]  ;;  %v289_v24 = vld [vmem:[#allocation3 + $0x6] sm:$0x3]  ;;  %v368_v29 = vld [vmem:[#allocation3 + $0x8] sm:$0x3] }
  0x2b   :  { %840 = vmatpush3.bf16.msra.mxu0 %v1044_v5  ;;  %846 = vmatpush3.bf16.msra.mxu1 %v1044_v5  ;;  %v447_v34 = vld [vmem:[#allocation3 + $0xa] sm:$0x3]  ;;  %v526_v39 = vld [vmem:[#allocation3 + $0xc] sm:$0x3]  ;;  %v605_v44 = vld [vmem:[#allocation3 + $0xe] sm:$0x3] }
  0x2c   :  { %841 = vmatprep.subr.bf16.mxu0 %v990_v0  ;;  %847 = vmatprep.subr.bf16.mxu1 %v990_v0  ;;  %s689_s8 = sshll.u32 %s993_s1, 4  ;;  %s690_s8 = int_to_ptr.vmem [resolvable:$true] %s689_s8 }
  0x2d   :  { %s956_s9 = scalar_lea.vmem %s690_s8, 256  ;;  %p961_p3 = scmp.lt.s32.totalorder %s690_s8, %s690_s8 }
  0x2e   :  { %p957_p2 = scmp.ne.s32.totalorder %s690_s8, %s956_s9  ;;  %p962_p4 = scmp.lt.s32.totalorder %s956_s9, %s956_s9 }
  0x2f   :  { %843 = vmatpush3.bf16.msra.mxu0 %v1047_v7  ;;  %v50_v8 = vld [vmem:[#allocation2] sm:$0x3]  ;;  %849 = vmatpush3.bf16.msra.mxu1 %v1047_v7 }
  0x30   :  { %850 = vmatprep.subr.bf16.mxu0 %v990_v0  ;;  %856 = vmatprep.subr.bf16.mxu1 %v990_v0  ;;  %p963_p5 = por %p962_p4, %p961_p3 }
  0x32   :  { %759 = vmatmul.mubr.msk.f32.vlgmr.msra.gmra.mrb[0].mxu0 %vm52_vm2, %v50_v8  ;;  %p964_p6 = pnand %p963_p5, %p957_p2 }
  0x33   :  { %852 = vmatpush3.bf16.msra.mxu0 %v1044_v5  ;;  %780 = vmatprep.mubr.msk.f32.mxu0 %vm991_vm1, %v992_v1 }
  0x34   :  { %853 = vmatprep.subr.bf16.mxu0 %v990_v0 }
  0x37   :  { %855 = vmatpush3.bf16.msra.mxu0 %v1047_v7 }
  0x38   :  { %862 = vmatprep.subr.bf16.mxu0 %v990_v0 }
 0x105   :  { %v122_v10 = vpop.f32.mrb[0].mxu0 }
 0x106   :  { %v126_v11 = vadd.f32 %v122_v10, %v51_v9  ;;  %v760_v12 = vpop.f32.mrb[1].mxu0 }
 0x108   :  { %896 = vtanh.f32 %v126_v11 }
 0x112   :  { %v897_v13 = vpop.eup %896 }
 0x113   :  { %129 = vst.msk [vmem:[#allocation8] sm:$0x3] %vm44_vm0, %v897_v13  ;;  %770 = vmatmul.mubr.msk.f32.vlgmr.msra.gmra.mrb[0].mxu1 %vm52_vm2, %v897_v13 }
 0x114   :  { %858 = vmatpush3.bf16.msra.mxu1 %v1044_v5  ;;  %791 = vmatprep.mubr.msk.f32.mxu1 %vm991_vm1, %v992_v1 }
 0x115   :  { %859 = vmatprep.subr.bf16.mxu1 %v990_v0 }
 0x118   :  { %861 = vmatpush3.bf16.msra.mxu1 %v1047_v7 }
 0x119   :  { %868 = vmatprep.subr.bf16.mxu1 %v990_v0 }
 0x1e6   :  { %v201_v15 = vpop.f32.mrb[0].mxu1 }
 0x1e7   :  { %v205_v16 = vadd.f32 %v201_v15, %v131_v14  ;;  %v771_v17 = vpop.f32.mrb[1].mxu1 }
 0x1e9   :  { %898 = vtanh.f32 %v205_v16 }
 0x1f3   :  { %v899_v18 = vpop.eup %898 }
 0x1f4   :  { %208 = vst.msk [vmem:[#allocation8 + $0x2] sm:$0x3] %vm44_vm0, %v899_v18  ;;  %781 = vmatmul.mubr.msk.f32.vlgmr.msra.gmra.mrb[2].mxu0 %vm52_vm2, %v899_v18 }
 0x1f5   :  { %864 = vmatpush3.bf16.msra.mxu0 %v1044_v5  ;;  %802 = vmatprep.mubr.msk.f32.mxu0 %vm991_vm1, %v992_v1 }
 0x1f6   :  { %865 = vmatprep.subr.bf16.mxu0 %v990_v0 }
 0x1f9   :  { %867 = vmatpush3.bf16.msra.mxu0 %v1047_v7 }
 0x1fa   :  { %874 = vmatprep.subr.bf16.mxu0 %v990_v0 }
 0x2c7   :  { %v280_v20 = vpop.f32.mrb[2].mxu0 }
 0x2c8   :  { %v284_v21 = vadd.f32 %v280_v20, %v210_v19  ;;  %v782_v22 = vpop.f32.mrb[3].mxu0 }
 0x2ca   :  { %900 = vtanh.f32 %v284_v21 }
 0x2d4   :  { %v901_v23 = vpop.eup %900 }
 0x2d5   :  { %287 = vst.msk [vmem:[#allocation8 + $0x4] sm:$0x3] %vm44_vm0, %v901_v23  ;;  %792 = vmatmul.mubr.msk.f32.vlgmr.msra.gmra.mrb[2].mxu1 %vm52_vm2, %v901_v23 }
 0x2d6   :  { %870 = vmatpush3.bf16.msra.mxu1 %v1044_v5  ;;  %813 = vmatprep.mubr.msk.f32.mxu1 %vm991_vm1, %v992_v1 }
 0x2d7   :  { %871 = vmatprep.subr.bf16.mxu1 %v990_v0 }
 0x2da   :  { %873 = vmatpush3.bf16.msra.mxu1 %v1047_v7 }
 0x2db   :  { %880 = vmatprep.subr.bf16.mxu1 %v990_v0 }
 0x3a8   :  { %v359_v25 = vpop.f32.mrb[2].mxu1 }
 0x3a9   :  { %v363_v26 = vadd.f32 %v359_v25, %v289_v24  ;;  %v793_v27 = vpop.f32.mrb[3].mxu1 }
 0x3ab   :  { %902 = vtanh.f32 %v363_v26 }
 0x3b5   :  { %v903_v28 = vpop.eup %902 }
 0x3b6   :  { %366 = vst.msk [vmem:[#allocation8 + $0x6] sm:$0x3] %vm44_vm0, %v903_v28  ;;  %803 = vmatmul.mubr.msk.f32.vlgmr.msra.gmra.mrb[4].mxu0 %vm52_vm2, %v903_v28 }
 0x3b7   :  { %876 = vmatpush3.bf16.msra.mxu0 %v1044_v5  ;;  %824 = vmatprep.mubr.msk.f32.mxu0 %vm991_vm1, %v992_v1 }
 0x3b8   :  { %877 = vmatprep.subr.bf16.mxu0 %v990_v0 }
 0x3bb   :  { %879 = vmatpush3.bf16.msra.mxu0 %v1047_v7 }
 0x489   :  { %v438_v30 = vpop.f32.mrb[4].mxu0 }
 0x48a   :  { %v442_v31 = vadd.f32 %v438_v30, %v368_v29  ;;  %v804_v32 = vpop.f32.mrb[5].mxu0 }
 0x48c   :  { %904 = vtanh.f32 %v442_v31 }
 0x496   :  { %v905_v33 = vpop.eup %904 }
 0x497   :  { %445 = vst.msk [vmem:[#allocation8 + $0x8] sm:$0x3] %vm44_vm0, %v905_v33  ;;  %814 = vmatmul.mubr.msk.f32.vlgmr.msra.gmra.mrb[4].mxu1 %vm52_vm2, %v905_v33 }
 0x498   :  { %882 = vmatpush3.bf16.msra.mxu1 %v1044_v5  ;;  %835 = vmatprep.mubr.msk.f32.mxu1 %vm991_vm1, %v992_v1 }
 0x499   :  { %883 = vmatprep.subr.bf16.mxu1 %v990_v0 }
 0x49c   :  { %885 = vmatpush3.bf16.msra.mxu1 %v1047_v7 }
 0x56a   :  { %v517_v35 = vpop.f32.mrb[4].mxu1 }
 0x56b   :  { %v521_v36 = vadd.f32 %v517_v35, %v447_v34  ;;  %v815_v37 = vpop.f32.mrb[5].mxu1 }
 0x56d   :  { %906 = vtanh.f32 %v521_v36 }
 0x577   :  { %v907_v38 = vpop.eup %906 }
 0x578   :  { %524 = vst.msk [vmem:[#allocation8 + $0xa] sm:$0x3] %vm44_vm0, %v907_v38  ;;  %825 = vmatmul.mubr.msk.f32.vlgmr.msra.gmra.mrb[6].mxu0 %vm52_vm2, %v907_v38 }
 0x64b   :  { %v596_v40 = vpop.f32.mrb[6].mxu0 }
 0x64c   :  { %v600_v41 = vadd.f32 %v596_v40, %v526_v39  ;;  %v826_v42 = vpop.f32.mrb[7].mxu0 }
 0x64e   :  { %908 = vtanh.f32 %v600_v41 }
 0x658   :  { %v909_v43 = vpop.eup %908 }
 0x659   :  { %603 = vst.msk [vmem:[#allocation8 + $0xc] sm:$0x3] %vm44_vm0, %v909_v43  ;;  %836 = vmatmul.mubr.msk.f32.vlgmr.msra.gmra.mrb[6].mxu1 %vm52_vm2, %v909_v43 }
 0x72c   :  { %v675_v45 = vpop.f32.mrb[6].mxu1 }
 0x72d   :  { %v679_v46 = vadd.f32 %v675_v45, %v605_v44  ;;  %v837_v47 = vpop.f32.mrb[7].mxu1 }
 0x72f   :  { %910 = vtanh.f32 %v679_v46 }
 0x739   :  { %v911_v48 = vpop.eup %910 }
 0x73a   :  { %683 = vst.msk [vmem:[#allocation2] sm:$0x3] %vm44_vm0, %v911_v48  ;;  %682 = vst.msk [vmem:[#allocation8 + $0xe] sm:$0x3] %vm44_vm0, %v911_v48 }
 0x73b   :  { %967 = shalt.err (!%p964_p6)
}
 0x73c   :  { %s968_s12 = scalar_lea.hbm %s1124_s2, 256 }
 0x73d   :  { %p969_p7 = scmp.ne.s32.totalorder %s1124_s2, %s968_s12  ;;  %p972_p8 = scmp.lt.u32.totalorder %s968_s12, %s1124_s2 }
 0x73f   :  { %p974_p9 = pnand %p972_p8, %p969_p7 }
 0x741   :  { %977 = shalt.err (!%p974_p9)
}
 0x742   :  { %695 = dma.vmem_to_hbm [thread:$0]  %s690_s8, 256, %s1124_s2, [#allocation5], %s985_s19, %s985_s19, %s986_s20  }
 0x743   :  { %982 = dma.done.wait [#allocation5], 256  }
 0x744   :  { %983 = vsyncadd [#allocation5], 4294967040 }
 0x745   :  { %699 = vsyncpa [#allocation4], 1 }
 0x746   :  { %700 = vsyncpa [#allocation7], 1 }
 0x747   :  { %701 = vsyncpa [#allocation5], 1 }

</bundles_post_ra>
